<compile_context>
chip_gen: v7x
topology: tpu7x:2x2x1
jax: 0.10.0
libtpu: 0.0.40
codegen_flags: <defaults>
</compile_context>

<pallas_src>
import functools

import jax
import jax.numpy as jnp
from jax.experimental import pallas as pl
from jax.experimental.pallas import tpu as pltpu


def _round_up(x, m):
    return ((x + m - 1) // m) * m


def _classification_kernel(
    x_ref,        # [TB, D_in]  f32   input tile
    w0_ref,       # [D_in, H]   bf16  embedding layer 1 weight (resident)
    b0_ref,       # [1, H]      f32   embedding layer 1 bias   (resident)
    w1_ref,       # [H, L]      bf16  embedding layer 2 weight (resident)
    b1_ref,       # [1, L]      f32   embedding layer 2 bias   (resident)
    alpha_ref,    # [1, 1]      f32   PReLU slope, SMEM scalar
    wfc_ref,      # [L, C]      bf16  fc1 weight (resident)
    bfc_ref,      # [1, C]      f32   fc1 bias   (resident)
    out_ref,      # [TB, C]     f32   log-softmax scores tile
):
    x = x_ref[...]

    # ---- embedding_net: Linear -> ReLU -> Linear (bf16 MXU operands, f32 acc) ----
    h = jnp.dot(x.astype(jnp.bfloat16), w0_ref[...],
                preferred_element_type=jnp.float32) + b0_ref[...]
    h = jnp.maximum(h, 0.0)                               # ReLU in f32 (VPU)
    emb = jnp.dot(h.astype(jnp.bfloat16), w1_ref[...],
                  preferred_element_type=jnp.float32) + b1_ref[...]

    # ---- PReLU (single shared slope, torch default num_parameters=1) ----
    alpha = alpha_ref[0, 0]                               # SMEM scalar
    act = jnp.where(emb >= 0.0, emb, alpha * emb)

    # ---- fc1: Linear(latent -> n_classes) ----
    logits = jnp.dot(act.astype(jnp.bfloat16), wfc_ref[...],
                     preferred_element_type=jnp.float32) + bfc_ref[...]

    # ---- numerically stable log_softmax along dim=-1 (f32) ----
    m = jnp.max(logits, axis=-1, keepdims=True)
    shifted = logits - m
    lse = jnp.log(jnp.sum(jnp.exp(shifted), axis=-1, keepdims=True))
    out_ref[...] = (shifted - lse).astype(out_ref.dtype)


def classification_net_forward(x, params, *, max_block_b=1024):
    """x: [B, D_in] float32. params: dict of weights (see init_params)."""
    B, D_in = x.shape
    H = params["w0"].shape[1]
    L = params["w1"].shape[1]
    C = params["wfc"].shape[1]

    # ---- batch tile: multiple of 8 (f32 sublane), capped for VMEM headroom ----
    TB = min(max_block_b, _round_up(B, 8))
    TB = max(8, (TB // 8) * 8)
    Bp = _round_up(B, TB)
    if Bp != B:
        x = jnp.pad(x, ((0, Bp - B), (0, 0)))
    grid = (Bp // TB,)

    # ---- advisory cost estimate for XLA scheduling ----
    flops = int(2 * Bp * (D_in * H + H * L + L * C))
    bytes_accessed = int(
        Bp * D_in * 4                                   # input stream
        + Bp * C * 4                                    # output stream
        + sum(int(p.size) * p.dtype.itemsize for p in params.values())
    )
    transcendentals = int(Bp * (C + 1))                 # exp per logit + log per row

    def resident(arr):
        # full-array block, constant block index -> DMA'd once, stays in VMEM
        return pl.BlockSpec(arr.shape, lambda i, _nd=arr.ndim: (0,) * _nd)

    out = pl.pallas_call(
        _classification_kernel,
        out_shape=jax.ShapeDtypeStruct((Bp, C), jnp.float32),
        grid=grid,
        in_specs=[
            pl.BlockSpec((TB, D_in), lambda i: (i, 0)),          # x: batch-tiled
            resident(params["w0"]), resident(params["b0"]),
            resident(params["w1"]), resident(params["b1"]),
            pl.BlockSpec(memory_space=pltpu.MemorySpace.SMEM),   # alpha scalar
            resident(params["wfc"]), resident(params["bfc"]),
        ],
        out_specs=pl.BlockSpec((TB, C), lambda i: (i, 0)),
        compiler_params=pltpu.CompilerParams(
            dimension_semantics=("parallel",),                    # v7x: 2 TCs
        ),
        cost_estimate=pl.CostEstimate(
            flops=flops,
            transcendentals=transcendentals,
            bytes_accessed=bytes_accessed,
        ),
    )(
        x,
        params["w0"], params["b0"],
        params["w1"], params["b1"],
        params["alpha"],
        params["wfc"], params["bfc"],
    )
    return out[:B]


def init_params(key, d_in, hidden, latent, n_classes):
    """Deterministic synthetic parameter init (shapes implied by the module).

    Matmul weights are stored in bf16 (halves their HBM traffic; MXU-native),
    biases and the PReLU slope stay f32.
    """
    k0, k1, k2, k3, k4, k5 = jax.random.split(key, 6)
    scale = 0.1
    return {
        "w0": (scale * jax.random.normal(k0, (d_in, hidden), jnp.float32)).astype(jnp.bfloat16),
        "b0": scale * jax.random.normal(k1, (1, hidden), jnp.float32),
        "w1": (scale * jax.random.normal(k2, (hidden, latent), jnp.float32)).astype(jnp.bfloat16),
        "b1": scale * jax.random.normal(k3, (1, latent), jnp.float32),
        # nn.PReLU() default: single parameter initialized to 0.25
        "alpha": jnp.full((1, 1), 0.25, jnp.float32),
        "wfc": (scale * jax.random.normal(k4, (latent, n_classes), jnp.float32)).astype(jnp.bfloat16),
        "bfc": scale * jax.random.normal(k5, (1, n_classes), jnp.float32),
    }


def _reference_forward_bf16(x, p):
    """Pure-JAX reference using the same bf16-at-the-dot scheme as the kernel."""
    h = jnp.dot(x.astype(jnp.bfloat16), p["w0"], preferred_element_type=jnp.float32) + p["b0"]
    h = jnp.maximum(h, 0.0)
    emb = jnp.dot(h.astype(jnp.bfloat16), p["w1"], preferred_element_type=jnp.float32) + p["b1"]
    act = jnp.where(emb >= 0.0, emb, p["alpha"][0, 0] * emb)
    logits = jnp.dot(act.astype(jnp.bfloat16), p["wfc"], preferred_element_type=jnp.float32) + p["bfc"]
    return jax.nn.log_softmax(logits, axis=-1)


def _reference_forward_f32(x, p):
    """Full-f32 reference (PyTorch-semantics sanity check, looser tolerance)."""
    w0 = p["w0"].astype(jnp.float32)
    w1 = p["w1"].astype(jnp.float32)
    wfc = p["wfc"].astype(jnp.float32)
    h = jnp.maximum(x @ w0 + p["b0"], 0.0)
    emb = h @ w1 + p["b1"]
    act = jnp.where(emb >= 0.0, emb, p["alpha"][0, 0] * emb)
    logits = act @ wfc + p["bfc"]
    return jax.nn.log_softmax(logits, axis=-1)


if __name__ == "__main__":
    # Small shapes consistent with the module:
    #   units_latent_layer = 32, units_decision_layer = 8
    B, D_IN, HIDDEN, LATENT, N_CLASSES = 8, 64, 128, 32, 8

    key = jax.random.PRNGKey(0)
    kx, kp = jax.random.split(key)
    x = jax.random.normal(kx, (B, D_IN), jnp.float32)
    params = init_params(kp, D_IN, HIDDEN, LATENT, N_CLASSES)

    scores = classification_net_forward(x, params)
    scores = jax.block_until_ready(scores)
    assert scores.shape == (B, N_CLASSES)

    # Tight check vs a reference computed with the identical bf16/f32 scheme.
    ref_bf16 = _reference_forward_bf16(x, params)
    assert jnp.allclose(scores, ref_bf16, atol=1e-3, rtol=1e-3), "mismatch vs bf16 reference"

    # Loose check vs the full-f32 torch-semantics reference.
    ref_f32 = _reference_forward_f32(x, params)
    assert jnp.allclose(scores, ref_f32, atol=5e-2, rtol=5e-2), "mismatch vs f32 reference"

    # log_softmax rows must exponentiate to ~1.
    row_sums = jnp.sum(jnp.exp(scores), axis=-1)
    assert jnp.allclose(row_sums, 1.0, atol=1e-4), "rows do not normalize"

    print("KERNEL_OK")
</pallas_src>

<mosaic_0001>
module attributes {stable_mosaic.version = 11 : i64} {
  func.func @_classification_kernel(%arg0: i32, %arg1: memref<8x64xf32, #tpu.memory_space<vmem>>, %arg2: memref<64x128xbf16, #tpu.memory_space<vmem>>, %arg3: memref<1x128xf32, #tpu.memory_space<vmem>>, %arg4: memref<128x32xbf16, #tpu.memory_space<vmem>>, %arg5: memref<1x32xf32, #tpu.memory_space<vmem>>, %arg6: memref<1x1xf32, #tpu.memory_space<smem>>, %arg7: memref<32x8xbf16, #tpu.memory_space<vmem>>, %arg8: memref<1x8xf32, #tpu.memory_space<vmem>>, %arg9: memref<8x8xf32, #tpu.memory_space<vmem>>) attributes {dimension_semantics = [#tpu.dimension_semantics<parallel>], iteration_bounds = array<i64: 1>, scalar_prefetch = 0 : i64, scratch_operands = 0 : i64, tpu.core_type = #tpu.core_type<tc>, window_params = [{transform_indices = @transform_0, window_bounds = array<i64: 8, 64>}, {pipeline_mode = #tpu.pipeline_mode<synchronous>, transform_indices = @transform_1, window_bounds = array<i64: 64, 128>}, {pipeline_mode = #tpu.pipeline_mode<synchronous>, transform_indices = @transform_2, window_bounds = array<i64: 1, 128>}, {pipeline_mode = #tpu.pipeline_mode<synchronous>, transform_indices = @transform_3, window_bounds = array<i64: 128, 32>}, {pipeline_mode = #tpu.pipeline_mode<synchronous>, transform_indices = @transform_4, window_bounds = array<i64: 1, 32>}, {transform_indices = @transform_5, window_bounds = array<i64: 1, 1>}, {pipeline_mode = #tpu.pipeline_mode<synchronous>, transform_indices = @transform_6, window_bounds = array<i64: 32, 8>}, {pipeline_mode = #tpu.pipeline_mode<synchronous>, transform_indices = @transform_7, window_bounds = array<i64: 1, 8>}, {transform_indices = @transform_8, window_bounds = array<i64: 8, 8>}]} {
    %c0 = arith.constant 0 : index
    %c0_0 = arith.constant 0 : index
    %0 = vector.load %arg1[%c0, %c0_0] : memref<8x64xf32, #tpu.memory_space<vmem>>, vector<8x64xf32>
    %1 = arith.truncf %0 : vector<8x64xf32> to vector<8x64xbf16>
    %c0_1 = arith.constant 0 : index
    %c0_2 = arith.constant 0 : index
    %2 = vector.load %arg2[%c0_1, %c0_2] : memref<64x128xbf16, #tpu.memory_space<vmem>>, vector<64x128xbf16>
    %cst = arith.constant dense<0.000000e+00> : vector<8x128xf32>
    %3 = tpu.matmul %1, %2, %cst {dimension_numbers = #tpu.dot_dimension_numbers<[1], [0], [0], [1], [0, 0, 1, 1], [], []>} : vector<8x64xbf16>, vector<64x128xbf16>, vector<8x128xf32> -> vector<8x128xf32>
    %c0_3 = arith.constant 0 : index
    %c0_4 = arith.constant 0 : index
    %4 = vector.load %arg3[%c0_3, %c0_4] : memref<1x128xf32, #tpu.memory_space<vmem>>, vector<1x128xf32>
    %5 = vector.broadcast %4 : vector<1x128xf32> to vector<8x128xf32>
    %6 = arith.addf %3, %5 : vector<8x128xf32>
    %cst_5 = arith.constant 0.000000e+00 : f32
    %7 = vector.broadcast %cst_5 : f32 to vector<8x128xf32>
    %8 = arith.maximumf %6, %7 : vector<8x128xf32>
    %9 = arith.truncf %8 : vector<8x128xf32> to vector<8x128xbf16>
    %c0_6 = arith.constant 0 : index
    %c0_7 = arith.constant 0 : index
    %10 = vector.load %arg4[%c0_6, %c0_7] : memref<128x32xbf16, #tpu.memory_space<vmem>>, vector<128x32xbf16>
    %cst_8 = arith.constant dense<0.000000e+00> : vector<8x32xf32>
    %11 = tpu.matmul %9, %10, %cst_8 {dimension_numbers = #tpu.dot_dimension_numbers<[1], [0], [0], [1], [0, 0, 1, 1], [], []>} : vector<8x128xbf16>, vector<128x32xbf16>, vector<8x32xf32> -> vector<8x32xf32>
    %c0_9 = arith.constant 0 : index
    %c0_10 = arith.constant 0 : index
    %12 = vector.load %arg5[%c0_9, %c0_10] : memref<1x32xf32, #tpu.memory_space<vmem>>, vector<1x32xf32>
    %13 = vector.broadcast %12 : vector<1x32xf32> to vector<8x32xf32>
    %14 = arith.addf %11, %13 : vector<8x32xf32>
    %c0_11 = arith.constant 0 : index
    %c0_12 = arith.constant 0 : index
    %15 = memref.load %arg6[%c0_11, %c0_12] : memref<1x1xf32, #tpu.memory_space<smem>>
    %cst_13 = arith.constant 0.000000e+00 : f32
    %16 = vector.broadcast %cst_13 : f32 to vector<8x32xf32>
    %17 = arith.cmpf oge, %14, %16 : vector<8x32xf32>
    %18 = vector.broadcast %15 : f32 to vector<8x32xf32>
    %19 = arith.mulf %18, %14 : vector<8x32xf32>
    %20 = arith.select %17, %14, %19 : vector<8x32xi1>, vector<8x32xf32>
    %21 = arith.truncf %20 : vector<8x32xf32> to vector<8x32xbf16>
    %c0_14 = arith.constant 0 : index
    %c0_15 = arith.constant 0 : index
    %22 = vector.load %arg7[%c0_14, %c0_15] : memref<32x8xbf16, #tpu.memory_space<vmem>>, vector<32x8xbf16>
    %cst_16 = arith.constant dense<0.000000e+00> : vector<8x8xf32>
    %23 = tpu.matmul %21, %22, %cst_16 {dimension_numbers = #tpu.dot_dimension_numbers<[1], [0], [0], [1], [0, 0, 1, 1], [], []>} : vector<8x32xbf16>, vector<32x8xbf16>, vector<8x8xf32> -> vector<8x8xf32>
    %c0_17 = arith.constant 0 : index
    %c0_18 = arith.constant 0 : index
    %24 = vector.load %arg8[%c0_17, %c0_18] : memref<1x8xf32, #tpu.memory_space<vmem>>, vector<1x8xf32>
    %25 = vector.broadcast %24 : vector<1x8xf32> to vector<8x8xf32>
    %26 = arith.addf %23, %25 : vector<8x8xf32>
    %cst_19 = arith.constant dense<0xFF800000> : vector<8xf32>
    %27 = vector.multi_reduction <maximumf>, %26, %cst_19 [1] : vector<8x8xf32> to vector<8xf32>
    %28 = vector.shape_cast %27 : vector<8xf32> to vector<8x1xf32>
    %29 = vector.broadcast %28 : vector<8x1xf32> to vector<8x8xf32>
    %30 = arith.subf %26, %29 : vector<8x8xf32>
    %31 = math.exp %30 : vector<8x8xf32>
    %cst_20 = arith.constant dense<0.000000e+00> : vector<8xf32>
    %32 = vector.multi_reduction <add>, %31, %cst_20 [1] : vector<8x8xf32> to vector<8xf32>
    %33 = vector.shape_cast %32 : vector<8xf32> to vector<8x1xf32>
    %34 = math.log %33 : vector<8x1xf32>
    %35 = vector.broadcast %34 : vector<8x1xf32> to vector<8x8xf32>
    %36 = arith.subf %30, %35 : vector<8x8xf32>
    %c0_21 = arith.constant 0 : index
    %c0_22 = arith.constant 0 : index
    %37 = vector.load %arg9[%c0_21, %c0_22] : memref<8x8xf32, #tpu.memory_space<vmem>>, vector<8x8xf32>
    tpu.vector_store %arg9[%c0_21, %c0_22], %36 {strides = array<i32>} : memref<8x8xf32, #tpu.memory_space<vmem>>, vector<8x8xf32>,
    return
  }
  func.func @transform_0(%arg0: i32) -> (i32, i32) {
    %c0_i32 = arith.constant 0 : i32
    %c0_i32_0 = arith.constant 0 : i32
    return %arg0, %c0_i32 : i32, i32
  }
  func.func @transform_1(%arg0: i32) -> (i32, i32) {
    %c0_i32 = arith.constant 0 : i32
    %c0_i32_0 = arith.constant 0 : i32
    %c0_i32_1 = arith.constant 0 : i32
    return %c0_i32, %c0_i32_0 : i32, i32
  }
  func.func @transform_2(%arg0: i32) -> (i32, i32) {
    %c0_i32 = arith.constant 0 : i32
    %c0_i32_0 = arith.constant 0 : i32
    %c0_i32_1 = arith.constant 0 : i32
    return %c0_i32, %c0_i32_0 : i32, i32
  }
  func.func @transform_3(%arg0: i32) -> (i32, i32) {
    %c0_i32 = arith.constant 0 : i32
    %c0_i32_0 = arith.constant 0 : i32
    %c0_i32_1 = arith.constant 0 : i32
    return %c0_i32, %c0_i32_0 : i32, i32
  }
  func.func @transform_4(%arg0: i32) -> (i32, i32) {
    %c0_i32 = arith.constant 0 : i32
    %c0_i32_0 = arith.constant 0 : i32
    %c0_i32_1 = arith.constant 0 : i32
    return %c0_i32, %c0_i32_0 : i32, i32
  }
  func.func @transform_5(%arg0: i32) -> (i32, i32) {
    %c0_i32 = arith.constant 0 : i32
    %c0_i32_0 = arith.constant 0 : i32
    %c0_i32_1 = arith.constant 0 : i32
    return %c0_i32, %c0_i32_0 : i32, i32
  }
  func.func @transform_6(%arg0: i32) -> (i32, i32) {
    %c0_i32 = arith.constant 0 : i32
    %c0_i32_0 = arith.constant 0 : i32
    %c0_i32_1 = arith.constant 0 : i32
    return %c0_i32, %c0_i32_0 : i32, i32
  }
  func.func @transform_7(%arg0: i32) -> (i32, i32) {
    %c0_i32 = arith.constant 0 : i32
    %c0_i32_0 = arith.constant 0 : i32
    %c0_i32_1 = arith.constant 0 : i32
    return %c0_i32, %c0_i32_0 : i32, i32
  }
  func.func @transform_8(%arg0: i32) -> (i32, i32) {
    %c0_i32 = arith.constant 0 : i32
    %c0_i32_0 = arith.constant 0 : i32
    return %arg0, %c0_i32 : i32, i32
  }
}

</mosaic_0001>

<bundles_post_ra>
// kernel: tpu_custom_call.1
= control target key start
LH: loop header
LB: loop body
LE: loop exit
PB: predicated region body
PF: predicated region fallthrough
CT: control target
= control target key end

     0   :  { %v452_v1 = vmov 0.0   ;;  %vm453_vm0 = vmmov 0   ;;  %s575_s0 = inlined_call_operand.vmem [shape: f32[8,64], index: 0, kind: input, shape index: {}]   ;;  %s576_s1 = inlined_call_operand.vmem [shape: bf16[64,128], index: 1, kind: input, shape index: {}]   ;;  %s577_s2 = inlined_call_operand.vmem [shape: f32[1,128], index: 2, kind: input, shape index: {}]   ;;  %s578_s3 = inlined_call_operand.vmem [shape: bf16[128,32], index: 3, kind: input, shape index: {}]   ;;  %s579_s4 = inlined_call_operand.vmem [shape: f32[1,32], index: 4, kind: input, shape index: {}]   ;;  %s580_s5 = inlined_call_operand.<no memory space> [shape: f32[1,1], index: 5, kind: input, shape index: {}]   ;;  %s581_s6 = inlined_call_operand.vmem [shape: bf16[32,8], index: 6, kind: input, shape index: {}]   ;;  %s582_s7 = inlined_call_operand.vmem [shape: f32[1,8], index: 7, kind: input, shape index: {}]   ;;  %s583_s8 = inlined_call_operand.hbm [shape: f32[8,8], index: 8, kind: output, shape index: {}]  }
   0x1   :  { %v410_v0 = vld [vmem:[%s576_s1] sm:$0xff]   ;;  %367 = vmatprep.subr.bf16.mxu0 %v452_v1  ;;  %379 = vmatprep.subr.bf16.mxu1 %v452_v1  ;;  %v411_v2 = vld [vmem:[%s576_s1 + $0x8] sm:$0xff]   ;;  %v412_v4 = vld [vmem:[%s576_s1 + $0x10] sm:$0xff]  }
   0x2   :  { %368 = vmatpush3.bf16.msra.mxu0 %v410_v0  ;;  %375 = vmatprep.mubr.msk.bf16.mxu0 %vm453_vm0, %v452_v1  ;;  %v414_v3 = vld [vmem:[%s578_s3] sm:$0xff]   ;;  %v415_v5 = vld [vmem:[%s578_s3 + $0x8] sm:$0xff]   ;;  %v413_v6 = vld [vmem:[%s576_s1 + $0x18] sm:$0xff]  }
   0x3   :  { %369 = vmatprep.subr.bf16.mxu0 %v452_v1  ;;  %395 = vmatprep.mubr.msk.bf16.mxu1 %vm453_vm0, %v452_v1  ;;  %v32_v7 = vld [vmem:[%s575_s0] sm:$0xff]  ;;  %v416_v8 = vld [vmem:[%s578_s3 + $0x10] sm:$0xff]  }
   0x4   :  { %380 = vmatpush3.bf16.msra.mxu1 %v414_v3  ;;  %v33_v9 = vpack.c.bf16 %v32_v7, %v32_v7 }
   0x5   :  { %381 = vmatprep.subr.bf16.mxu1 %v452_v1 }
   0x6   :  { %370 = vmatpush3.bf16.msra.mxu0 %v411_v2 }
   0x7   :  { %371 = vmatprep.subr.bf16.mxu0 %v452_v1 }
   0x8   :  { %382 = vmatpush3.bf16.msra.mxu1 %v415_v5 }
   0x9   :  { %383 = vmatprep.subr.bf16.mxu1 %v452_v1 }
   0xa   :  { %372 = vmatpush3.bf16.msra.mxu0 %v412_v4 }
   0xb   :  { %373 = vmatprep.subr.bf16.mxu0 %v452_v1 }
   0xc   :  { %14 = vsyncpa [#allocation4], 0  ;;  %vm73_vm1 = vcmask 523264   ;;  %384 = vmatpush3.bf16.msra.mxu1 %v416_v8  ;;  %v417_v10 = vld [vmem:[%s578_s3 + $0x18] sm:$0xff]   ;;  %v418_v11 = vld [vmem:[%s578_s3 + $0x20] sm:$0xff]   ;;  %v232_v27 = vstv %s580_s5  ;;  %vm259_vm3 = vcmask 261120  }
   0xd   :  { %385 = vmatprep.subr.bf16.mxu1 %v452_v1  ;;  %v419_v12 = vld [vmem:[%s578_s3 + $0x28] sm:$0xff]   ;;  %v420_v13 = vld [vmem:[%s578_s3 + $0x30] sm:$0xff]   ;;  %v421_v14 = vld [vmem:[%s578_s3 + $0x38] sm:$0xff]   ;;  %vm303_vm4 = vcmask 64512  }
   0xe   :  { %374 = vmatpush3.bf16.msra.mxu0 %v413_v6  ;;  %v331_v15 = vld [vmem:[%s577_s2] ss:$0 sm:$0xff]  ;;  %v423_v24 = vld [vmem:[%s581_s6 + $0x8] sm:$0xff]  }
   0xf   :  { %399 = vmatprep.subr.bf16.mxu0 %v452_v1  ;;  %v422_v23 = vld [vmem:[%s581_s6] sm:$0xff]  }
  0x10   :  { %386 = vmatpush3.bf16.msra.mxu1 %v417_v10  ;;  %v337_v25 = vld [vmem:[%s579_s4] ss:$0 sm:$0xff]  ;;  %s454_s4 = smov [#allocation3]  }
  0x11   :  { %376 = vmatmul.mubr.msk.bf16.vlgmr.msra.gmra.mrb[0].mxu0 %vm73_vm1, %v33_v9  ;;  %387 = vmatprep.subr.bf16.mxu1 %v452_v1  ;;  %v346_v35 = vld [vmem:[%s582_s7] ss:$0 sm:$0xff]  ;;  %s323_s5 = sshll.u32 %s454_s4, 4  ;;  %s324_s5 = int_to_ptr.vmem [resolvable:$true] %s323_s5 }
  0x12   :  { %403 = vmatprep.mubr.msk.bf16.mxu0 %vm453_vm0, %v452_v1  ;;  %400 = vmatpush3.bf16.msra.mxu0 %v422_v23  ;;  %s428_s7 = scalar_lea.vmem %s324_s5, 128  ;;  %p433_p1 = scmp.lt.s32.totalorder %s324_s5, %s324_s5 }
  0x13   :  { %401 = vmatprep.subr.bf16.mxu0 %v452_v1  ;;  %p429_p0 = scmp.ne.s32.totalorder %s324_s5, %s428_s7  ;;  %p434_p2 = scmp.lt.s32.totalorder %s428_s7, %s428_s7 }
  0x14   :  { %388 = vmatpush3.bf16.msra.mxu1 %v418_v11 }
  0x15   :  { %389 = vmatprep.subr.bf16.mxu1 %v452_v1  ;;  %p435_p3 = por %p434_p2, %p433_p1 }
  0x16   :  { %402 = vmatpush3.bf16.msra.mxu0 %v423_v24 }
  0x17   :  { %p436_p4 = pnand %p435_p3, %p429_p0 }
  0x18   :  { %390 = vmatpush3.bf16.msra.mxu1 %v419_v12 }
  0x19   :  { %391 = vmatprep.subr.bf16.mxu1 %v452_v1 }
  0x1c   :  { %392 = vmatpush3.bf16.msra.mxu1 %v420_v13 }
  0x1d   :  { %393 = vmatprep.subr.bf16.mxu1 %v452_v1 }
  0x20   :  { %394 = vmatpush3.bf16.msra.mxu1 %v421_v14 }
  0xe4   :  { %v111_v16 = vpop.f32.mrb[0].mxu0 }
  0xe5   :  { %v112_v17 = vadd.f32 %v331_v15, %v111_v16  ;;  %v377_v18 = vpop.f32.mrb[1].mxu0 }
  0xe6   :  { %v114_v19 = vpop.f32.mrb[2].mxu0 }
  0xe7   :  { %v117_v20 = vmax.f32 %v112_v17, 0.0  ;;  %v378_v21 = vpop.f32.mrb[3].mxu0 }
  0xe9   :  { %v118_v22 = vpack.c.bf16 %v117_v20, %v117_v20 }
  0xeb   :  { %396 = vmatmul.mubr.bf16.vlgmr.msra.gmra.mrb[0].mxu1 %v118_v22 }
 0x1be   :  { %v224_v26 = vpop.f32.mrb[0].mxu1 }
 0x1bf   :  { %v225_v28 = vadd.f32 %v337_v25, %v224_v26  ;;  %v397_v29 = vpop.f32.mrb[1].mxu1 }
 0x1c0   :  { %v227_v30 = vpop.f32.mrb[2].mxu1 }
 0x1c1   :  { %vm231_vm2 = vcmp.ge.f32.partialorder %v225_v28, 0.0  ;;  %v233_v31 = vmul.f32 %v232_v27, %v225_v28  ;;  %v398_v32 = vpop.f32.mrb[3].mxu1 }
 0x1c3   :  { %v234_v33 = vsel %vm231_vm2, %v225_v28, %v233_v31 }
 0x1c4   :  { %v235_v34 = vpack.c.bf16 %v234_v33, %v234_v33 }
 0x1c6   :  { %404 = vmatmul.mubr.msk.bf16.vlgmr.msra.gmra.mrb[4].mxu0 %vm259_vm3, %v235_v34 }
 0x299   :  { %v297_v36 = vpop.f32.mrb[4].mxu0 }
 0x29a   :  { %v298_v37 = vadd.f32 %v346_v35, %v297_v36  ;;  %v405_v38 = vpop.f32.mrb[5].mxu0 }
 0x29b   :  { %v300_v39 = vpop.f32.mrb[6].mxu0 }
 0x29c   :  { %v406_v40 = vpop.f32.mrb[7].mxu0  ;;  %v304_v41 = vsel %vm303_vm4, %v298_v37, -inf }
 0x29d   :  { %305 = vmax.xlane.f32.xlu0 %v304_v41 }
 0x32a   :  { %v306_v42 = vpop.xlane.xlu0 %305 }
 0x32b   :  { %v307_v43 = vsub.f32 %v298_v37, %v306_v42 }
 0x32d   :  { %v308_v44 = vmul.f32 1.442695, %v307_v43 }
 0x32f   :  { %424 = vpow2.f32 %v308_v44 }
 0x339   :  { %v425_v45 = vpop.eup %424 }
 0x33a   :  { %v310_v46 = vsel %vm303_vm4, %v425_v45, 0.0 }
 0x33b   :  { %311 = vadd.xlane.f32.xlu0 %v310_v46 }
 0x3c8   :  { %v312_v47 = vpop.xlane.xlu0 %311 }
 0x3c9   :  { %426 = vlog2.f32 %v312_v47 }
 0x3d3   :  { %v427_v48 = vpop.eup %426 }
 0x3d4   :  { %v314_v49 = vmul.f32 0.6931472, %v427_v48 }
 0x3d6   :  { %v315_v50 = vsub.f32 %v307_v43, %v314_v49 }
 0x3d8   :  { %316 = vst.msk [vmem:[#allocation3] sm:$0xff] %vm303_vm4, %v315_v50 }
 0x3d9   :  { %439 = shalt.err (!%p436_p4)
}
 0x3da   :  { %s440_s18 = scalar_lea.hbm %s583_s8, 128 }
 0x3db   :  { %p441_p5 = scmp.ne.s32.totalorder %s583_s8, %s440_s18  ;;  %p444_p6 = scmp.lt.u32.totalorder %s440_s18, %s583_s8 }
 0x3dd   :  { %p446_p7 = pnand %p444_p6, %p441_p5 }
 0x3df   :  { %449 = shalt.err (!%p446_p7)
}
 0x3e0   :  { %326 = dma.vmem_to_hbm [thread:$0]  %s324_s5, 128, %s583_s8, [#allocation4]  }
 0x3e1   :  { %450 = dma.done.wait [#allocation4], 128  }
 0x3e2   :  { %451 = vsyncadd [#allocation4], 4294967168 }
 0x3e3   :  { %330 = vsyncpa [#allocation4], 1 }

</bundles_post_ra>
